<compile_context>
chip_gen: v7x
topology: tpu7x:2x2x1
jax: 0.10.0
libtpu: 0.0.40
codegen_flags: <defaults>
</compile_context>

<pallas_src>
import functools

import numpy as np
import jax
import jax.numpy as jnp
from jax.experimental import pallas as pl
from jax.experimental.pallas import tpu as pltpu


def _adaptive_pool_matrix(in_size: int, out_size: int) -> np.ndarray:
    """Row-stochastic A (out_size, in_size) with PyTorch adaptive_avg_pool bin edges."""
    A = np.zeros((out_size, in_size), dtype=np.float32)
    for i in range(out_size):
        start = (i * in_size) // out_size
        end = -(-((i + 1) * in_size) // out_size)  # ceil((i+1)*in/out)
        A[i, start:end] = 1.0 / float(end - start)
    return A


def _hint_loss_kernel(kt_ref, fs_ref, ft_ref, out_ref, *, block_c, c_total, needs_mask):
    """One channel tile (Bc rows of N*C) per grid step.

    kt_ref:  (hw_t, hw_s) f32  transposed Kronecker pooling matrix (constant)
    fs_ref:  (Bc, hw_s)        student tile, natural layout (channels on sublanes)
    ft_ref:  (Bc, hw_t)        teacher tile, natural layout
    out_ref: (1, 1, hw_s)      per-lane partial sums of squared error
    """
    # Adaptive avg pool for the whole channel tile: one MXU matmul, f32 accumulate.
    ft = ft_ref[...].astype(jnp.float32)  # no-op for f32 inputs
    pooled = jnp.dot(ft, kt_ref[...], preferred_element_type=jnp.float32)  # (Bc, hw_s)
    diff = fs_ref[...].astype(jnp.float32) - pooled
    sq = diff * diff
    if needs_mask:
        # Ragged tail tile: rows >= c_total are pipeline padding -> zero them out.
        row = jax.lax.broadcasted_iota(jnp.int32, sq.shape, 0)
        valid = (pl.program_id(0) * block_c + row) < c_total
        sq = jnp.where(valid, sq, 0.0)
    # Sublane (channel) reduce only; lanes stay dense for the store.
    out_ref[...] = jnp.sum(sq, axis=0, keepdims=True)[None]  # (1, 1, hw_s)


def _plan_tiles(c_total: int, hw_s: int, hw_t: int, itemsize: int):
    """Pick the channel tile Bc, grid size and an explicit VMEM limit.

    Returns (block_c, grid, vmem_limit_bytes).
    """
    # Sublane granule per dtype packing: f32 -> 8, bf16 -> 16, int8/fp8 -> 32.
    granule = max(8, 32 // max(itemsize, 1))

    k_bytes = hw_s * hw_t * 4
    # K is DMA'd once (constant index_map) but still reserves 2 pipeline buffers.
    fixed = 2 * k_bytes + (256 << 10)
    # Per channel-row: double-buffered fs/ft input blocks + f32 temporaries
    # (pooled, squared diff) that live in VMEM for large tiles.
    per_c = 2 * (hw_s + hw_t) * itemsize + 4 * (2 * hw_s)
    if itemsize != 4:
        per_c += 4 * (hw_s + hw_t)  # f32 casts of the tiles for accumulation

    budget = 36 << 20  # leaves headroom inside v7x's 64 MiB physical VMEM

    if c_total <= granule:
        block_c = c_total  # single block == full dim (always a legal block shape)
    else:
        avail = budget - fixed
        block_c = max(granule, (max(avail, 0) // per_c) // granule * granule)
        # Keep >= 2 grid steps so the "parallel" axis feeds both TensorCores (v7x).
        half = ((c_total + 1) // 2 + granule - 1) // granule * granule
        block_c = min(block_c, half)

    grid = pl.cdiv(c_total, block_c)
    need = fixed + per_c * block_c + 2 * (hw_s * 4)  # + double-buffered output block
    vmem_limit = int(min(max(need + (12 << 20), 32 << 20), 112 << 20))
    return block_c, grid, vmem_limit


def hint_loss(f_s: jax.Array, f_t: jax.Array) -> jax.Array:
    """FitNet hint loss. f_s: (N, C, Hs, Ws), f_t: (N, C, Ht, Wt), NCHW layout."""
    N, C, Hs, Ws = f_s.shape
    Nt, Ct, Ht, Wt = f_t.shape
    assert (N, C) == (Nt, Ct), "student/teacher must share batch and channel dims"

    c_total = N * C
    hw_s = Hs * Ws
    hw_t = Ht * Wt
    itemsize = jnp.dtype(f_s.dtype).itemsize

    block_c, grid, vmem_limit = _plan_tiles(c_total, hw_s, hw_t, itemsize)
    needs_mask = grid * block_c != c_total

    # Free views of the natural NCHW layout (no HBM traffic, no transpose, no pad).
    fs2 = f_s.reshape(c_total, hw_s)   # (N*C, Hs*Ws)
    ft2 = f_t.reshape(c_total, hw_t)   # (N*C, Ht*Wt)

    ah = _adaptive_pool_matrix(Ht, Hs)                    # (Hs, Ht)
    aw = _adaptive_pool_matrix(Wt, Ws)                    # (Ws, Wt)
    kt = jnp.asarray(np.kron(ah, aw).T, jnp.float32)      # (Ht*Wt, Hs*Ws)

    kernel = functools.partial(
        _hint_loss_kernel, block_c=block_c, c_total=c_total, needs_mask=needs_mask
    )

    partials = pl.pallas_call(
        kernel,
        out_shape=jax.ShapeDtypeStruct((grid, 1, hw_s), jnp.float32),
        grid_spec=pltpu.PrefetchScalarGridSpec(
            num_scalar_prefetch=0,
            grid=(grid,),
            in_specs=[
                pl.BlockSpec((hw_t, hw_s), lambda i: (0, 0)),   # pooling matrix (fetched once)
                pl.BlockSpec((block_c, hw_s), lambda i: (i, 0)),  # student channel rows
                pl.BlockSpec((block_c, hw_t), lambda i: (i, 0)),  # teacher channel rows
            ],
            out_specs=pl.BlockSpec((1, 1, hw_s), lambda i: (i, 0, 0)),
        ),
        compiler_params=pltpu.CompilerParams(
            dimension_semantics=("parallel",),  # independent partial sums -> megacore OK
            vmem_limit_bytes=vmem_limit,
        ),
    )(kt, fs2, ft2)

    # Final tree reduce + MSE mean division (true element count) in the wrapper.
    total = jnp.sum(partials)
    return total / jnp.float32(c_total * hw_s)


def _reference_hint_loss(f_s, f_t):
    """Pure-JAX reference (adaptive_avg_pool2d + MSE) for sanity checking."""
    _, _, Hs, Ws = f_s.shape
    _, _, Ht, Wt = f_t.shape
    ah = jnp.asarray(_adaptive_pool_matrix(Ht, Hs))
    aw = jnp.asarray(_adaptive_pool_matrix(Wt, Ws))
    pooled = jnp.einsum("ph,nchw,qw->ncpq", ah, f_t, aw)
    return jnp.mean((f_s - pooled) ** 2)


if __name__ == "__main__":
    key = jax.random.PRNGKey(0)
    k1, k2, k3, k4 = jax.random.split(key, 4)

    # Student features (N, C, Hs, Ws); teacher features (N, C, Ht, Wt), NCHW.
    f_s = jax.random.normal(k1, (2, 4, 8, 8), dtype=jnp.float32)
    f_t = jax.random.normal(k2, (2, 4, 16, 16), dtype=jnp.float32)

    loss = hint_loss(f_s, f_t)
    jax.block_until_ready(loss)
    ref = _reference_hint_loss(f_s, f_t)
    assert jnp.allclose(loss, ref, atol=1e-5, rtol=1e-5), (loss, ref)

    # Ragged channel count: exercises the masked tail tile and the 2-step parallel grid.
    f_s2 = jax.random.normal(k3, (3, 5, 8, 8), dtype=jnp.float32)
    f_t2 = jax.random.normal(k4, (3, 5, 16, 16), dtype=jnp.float32)
    loss2 = hint_loss(f_s2, f_t2)
    jax.block_until_ready(loss2)
    ref2 = _reference_hint_loss(f_s2, f_t2)
    assert jnp.allclose(loss2, ref2, atol=1e-5, rtol=1e-5), (loss2, ref2)

    print("KERNEL_OK")
</pallas_src>

<mosaic_0001>
module attributes {stable_mosaic.version = 11 : i64} {
  func.func @_hint_loss_kernel(%arg0: i32, %arg1: memref<256x64xf32, #tpu.memory_space<vmem>>, %arg2: memref<8x64xf32, #tpu.memory_space<vmem>>, %arg3: memref<8x256xf32, #tpu.memory_space<vmem>>, %arg4: memref<1x1x64xf32, #tpu.memory_space<vmem>>) attributes {dimension_semantics = [#tpu.dimension_semantics<parallel>], iteration_bounds = array<i64: 1>, scalar_prefetch = 0 : i64, scratch_operands = 0 : i64, tpu.core_type = #tpu.core_type<tc>, window_params = [{pipeline_mode = #tpu.pipeline_mode<synchronous>, transform_indices = @transform_0, window_bounds = array<i64: 256, 64>}, {transform_indices = @transform_1, window_bounds = array<i64: 8, 64>}, {transform_indices = @transform_2, window_bounds = array<i64: 8, 256>}, {transform_indices = @transform_3, window_bounds = array<i64: 1, 1, 64>}]} {
    %c0 = arith.constant 0 : index
    %c0_0 = arith.constant 0 : index
    %0 = vector.load %arg3[%c0, %c0_0] : memref<8x256xf32, #tpu.memory_space<vmem>>, vector<8x256xf32>
    %c0_1 = arith.constant 0 : index
    %c0_2 = arith.constant 0 : index
    %1 = vector.load %arg1[%c0_1, %c0_2] : memref<256x64xf32, #tpu.memory_space<vmem>>, vector<256x64xf32>
    %cst = arith.constant dense<0.000000e+00> : vector<8x64xf32>
    %2 = tpu.matmul %0, %1, %cst {dimension_numbers = #tpu.dot_dimension_numbers<[1], [0], [0], [1], [0, 0, 1, 1], [], []>} : vector<8x256xf32>, vector<256x64xf32>, vector<8x64xf32> -> vector<8x64xf32>
    %c0_3 = arith.constant 0 : index
    %c0_4 = arith.constant 0 : index
    %3 = vector.load %arg2[%c0_3, %c0_4] : memref<8x64xf32, #tpu.memory_space<vmem>>, vector<8x64xf32>
    %4 = arith.subf %3, %2 : vector<8x64xf32>
    %5 = arith.mulf %4, %4 : vector<8x64xf32>
    %cst_5 = arith.constant dense<0.000000e+00> : vector<64xf32>
    %6 = vector.multi_reduction <add>, %5, %cst_5 [0] : vector<8x64xf32> to vector<64xf32>
    %7 = vector.shape_cast %6 : vector<64xf32> to vector<1x64xf32>
    %8 = vector.shape_cast %7 : vector<1x64xf32> to vector<1x1x64xf32>
    %c0_6 = arith.constant 0 : index
    %c0_7 = arith.constant 0 : index
    %c0_8 = arith.constant 0 : index
    %9 = vector.load %arg4[%c0_6, %c0_7, %c0_8] : memref<1x1x64xf32, #tpu.memory_space<vmem>>, vector<1x1x64xf32>
    tpu.vector_store %arg4[%c0_6, %c0_7, %c0_8], %8 {strides = array<i32>} : memref<1x1x64xf32, #tpu.memory_space<vmem>>, vector<1x1x64xf32>,
    return
  }
  func.func @transform_0(%arg0: i32) -> (i32, i32) {
    %c0_i32 = arith.constant 0 : i32
    %c0_i32_0 = arith.constant 0 : i32
    %c0_i32_1 = arith.constant 0 : i32
    return %c0_i32, %c0_i32_0 : i32, i32
  }
  func.func @transform_1(%arg0: i32) -> (i32, i32) {
    %c0_i32 = arith.constant 0 : i32
    %c0_i32_0 = arith.constant 0 : i32
    return %arg0, %c0_i32 : i32, i32
  }
  func.func @transform_2(%arg0: i32) -> (i32, i32) {
    %c0_i32 = arith.constant 0 : i32
    %c0_i32_0 = arith.constant 0 : i32
    return %arg0, %c0_i32 : i32, i32
  }
  func.func @transform_3(%arg0: i32) -> (i32, i32, i32) {
    %c0_i32 = arith.constant 0 : i32
    %c0_i32_0 = arith.constant 0 : i32
    %c0_i32_1 = arith.constant 0 : i32
    return %arg0, %c0_i32, %c0_i32_0 : i32, i32, i32
  }
}

</mosaic_0001>

<bundles_post_ra>
// kernel: tpu_custom_call.1
= control target key start
LH: loop header
LB: loop body
LE: loop exit
PB: predicated region body
PF: predicated region fallthrough
CT: control target
= control target key end

     0   :  { %s376_s0 = inlined_call_operand.vmem [shape: f32[256,64], index: 0, kind: input, shape index: {}]   ;;  %s377_s1 = inlined_call_operand.vmem [shape: f32[8,64], index: 1, kind: input, shape index: {}]   ;;  %s378_s2 = inlined_call_operand.vmem [shape: f32[8,256], index: 2, kind: input, shape index: {}]   ;;  %s379_s3 = inlined_call_operand.hbm [shape: f32[1,1,64], index: 3, kind: output, shape index: {}]  }
   0x1   :  { %v33_v0 = vld [vmem:[%s376_s0 + $0x80] sm:$0xff]  ;;  %v34_v1 = vld [vmem:[%s376_s0 + $0x88] sm:$0xff]  ;;  %v35_v5 = vld [vmem:[%s376_s0 + $0x90] sm:$0xff] }
   0x2   :  { %v17_v2 = vld [vmem:[%s376_s0] sm:$0xff]  ;;  %v181_v3 = vpack.c.bf16 %v34_v1, %v33_v0  ;;  %v18_v4 = vld [vmem:[%s376_s0 + $0x8] sm:$0xff]  ;;  %v36_v6 = vld [vmem:[%s376_s0 + $0x98] sm:$0xff] }
   0x3   :  { %v183_v7 = vpack.c.bf16 %v18_v4, %v17_v2  ;;  %v185_v8 = vpack.c.bf16 %v36_v6, %v35_v5  ;;  %v19_v9 = vld [vmem:[%s376_s0 + $0x10] sm:$0xff]  ;;  %v20_v10 = vld [vmem:[%s376_s0 + $0x18] sm:$0xff]  ;;  %v37_v11 = vld [vmem:[%s376_s0 + $0xa0] sm:$0xff] }
   0x4   :  { %182 = vmatprep.subr.bf16.mxu0 %v181_v3  ;;  %v38_v12 = vld [vmem:[%s376_s0 + $0xa8] sm:$0xff]  ;;  %v187_v13 = vpack.c.bf16 %v20_v10, %v19_v9  ;;  %v21_v15 = vld [vmem:[%s376_s0 + $0x20] sm:$0xff]  ;;  %v39_v17 = vld [vmem:[%s376_s0 + $0xb0] sm:$0xff] }
   0x5   :  { %184 = vmatpush3.bf16.msra.mxu0 %v183_v7  ;;  %v189_v14 = vpack.c.bf16 %v38_v12, %v37_v11  ;;  %v22_v16 = vld [vmem:[%s376_s0 + $0x28] sm:$0xff]  ;;  %v40_v18 = vld [vmem:[%s376_s0 + $0xb8] sm:$0xff]  ;;  %v23_v21 = vld [vmem:[%s376_s0 + $0x30] sm:$0xff] }
   0x6   :  { %186 = vmatprep.subr.bf16.mxu0 %v185_v8  ;;  %v191_v19 = vpack.c.bf16 %v22_v16, %v21_v15  ;;  %v193_v20 = vpack.c.bf16 %v40_v18, %v39_v17  ;;  %v24_v22 = vld [vmem:[%s376_s0 + $0x38] sm:$0xff]  ;;  %v41_v23 = vld [vmem:[%s376_s0 + $0xc0] sm:$0xff]  ;;  %v42_v24 = vld [vmem:[%s376_s0 + $0xc8] sm:$0xff] }
   0x7   :  { %v16_v25 = vld [vmem:[%s378_s2 + $0x8] sm:$0xff] }
   0x8   :  { %113 = vmatprep.mubr.f32.mxu0 %v16_v25 }
   0x9   :  { %188 = vmatpush3.bf16.msra.mxu0 %v187_v13 }
   0xa   :  { %190 = vmatprep.subr.bf16.mxu0 %v189_v14 }
   0xb   :  { %8 = vsyncpa [#allocation3], 0  ;;  %v195_v26 = vpack.c.bf16 %v24_v22, %v23_v21  ;;  %v197_v27 = vpack.c.bf16 %v42_v24, %v41_v23  ;;  %v25_v28 = vld [vmem:[%s376_s0 + $0x40] sm:$0xff]  ;;  %v26_v29 = vld [vmem:[%s376_s0 + $0x48] sm:$0xff]  ;;  %vm122_vm0 = vcmask 523264   ;;  %vm130_vm1 = vcmask 516096  }
   0xc   :  { %v43_v30 = vld [vmem:[%s376_s0 + $0xd0] sm:$0xff]  ;;  %v44_v31 = vld [vmem:[%s376_s0 + $0xd8] sm:$0xff]  ;;  %v199_v32 = vpack.c.bf16 %v26_v29, %v25_v28  ;;  %v45_v36 = vld [vmem:[%s376_s0 + $0xe0] sm:$0xff] }
   0xd   :  { %192 = vmatpush3.bf16.msra.mxu0 %v191_v19  ;;  %v201_v33 = vpack.c.bf16 %v44_v31, %v43_v30  ;;  %v27_v34 = vld [vmem:[%s376_s0 + $0x50] sm:$0xff]  ;;  %v28_v35 = vld [vmem:[%s376_s0 + $0x58] sm:$0xff]  ;;  %v46_v37 = vld [vmem:[%s376_s0 + $0xe8] sm:$0xff] }
   0xe   :  { %194 = vmatprep.subr.bf16.mxu0 %v193_v20  ;;  %v203_v38 = vpack.c.bf16 %v28_v35, %v27_v34  ;;  %v205_v39 = vpack.c.bf16 %v46_v37, %v45_v36  ;;  %v29_v40 = vld [vmem:[%s376_s0 + $0x60] sm:$0xff]  ;;  %v30_v41 = vld [vmem:[%s376_s0 + $0x68] sm:$0xff]  ;;  %v47_v42 = vld [vmem:[%s376_s0 + $0xf0] sm:$0xff] }
   0xf   :  { %v48_v43 = vld [vmem:[%s376_s0 + $0xf8] sm:$0xff]  ;;  %v207_v44 = vpack.c.bf16 %v30_v41, %v29_v40  ;;  %v31_v46 = vld [vmem:[%s376_s0 + $0x70] sm:$0xff]  ;;  %v15_v49 = vld [vmem:[%s378_s2] sm:$0xff] }
  0x10   :  { %v209_v45 = vpack.c.bf16 %v48_v43, %v47_v42  ;;  %v32_v47 = vld [vmem:[%s376_s0 + $0x78] sm:$0xff]  ;;  %v119_v52 = vld [vmem:[%s377_s1] sm:$0xff]  ;;  %s238_s0 = smov [#allocation2]  }
  0x11   :  { %196 = vmatpush3.bf16.msra.mxu0 %v195_v26  ;;  %v211_v48 = vpack.c.bf16 %v32_v47, %v31_v46  ;;  %s138_s28 = sshll.u32 %s238_s0, 4  ;;  %s139_s28 = int_to_ptr.vmem [resolvable:$true] %s138_s28 }
  0x12   :  { %198 = vmatprep.subr.bf16.mxu0 %v197_v27  ;;  %s214_s2 = scalar_lea.vmem %s139_s28, 16  ;;  %s218_s29 = scalar_lea.vmem %s139_s28, 32 }
  0x13   :  { %p215_p0 = scmp.ne.s32.totalorder %s139_s28, %s214_s2  ;;  %p219_p1 = scmp.lt.s32.totalorder %s139_s28, %s139_s28 }
  0x14   :  { %p220_p2 = scmp.lt.s32.totalorder %s218_s29, %s214_s2 }
  0x15   :  { %200 = vmatpush3.bf16.msra.mxu0 %v199_v32 }
  0x16   :  { %202 = vmatprep.subr.bf16.mxu0 %v201_v33  ;;  %p221_p3 = por %p220_p2, %p219_p1 }
  0x18   :  { %p222_p4 = pnand %p221_p3, %p215_p0 }
  0x19   :  { %204 = vmatpush3.bf16.msra.mxu0 %v203_v38 }
  0x1a   :  { %206 = vmatprep.subr.bf16.mxu0 %v205_v39 }
  0x1d   :  { %208 = vmatpush3.bf16.msra.mxu0 %v207_v44 }
  0x1e   :  { %210 = vmatprep.subr.bf16.mxu0 %v209_v45 }
  0x21   :  { %212 = vmatpush3.bf16.msra.mxu0 %v211_v48 }
  0x24   :  { %114 = vmatmul.mubr.f32.vlgmr.msra.gmra.mrb[0].mxu0 %v15_v49 }
  0xf7   :  { %v178_v50 = vpop.f32.mrb[0].mxu0 }
  0xf8   :  { %v179_v51 = vpop.f32.mrb[1].mxu0 }
  0xf9   :  { %v180_v53 = vadd.f32 %v179_v51, %v178_v50 }
  0xfb   :  { %v120_v54 = vsub.f32 %v119_v52, %v180_v53 }
  0xfd   :  { %v121_v55 = vmul.f32 %v120_v54, %v120_v54 }
  0xff   :  { %v123_v56 = vsel %vm122_vm0, %v121_v55, 0.0 }
 0x100   :  { %v124_v57 = vrot.slane %v123_v56, 4 }
 0x102   :  { %v125_v58 = vadd.f32 %v124_v57, %v123_v56 }
 0x104   :  { %v126_v59 = vrot.slane %v125_v58, 2 }
 0x106   :  { %v127_v60 = vadd.f32 %v126_v59, %v125_v58 }
 0x108   :  { %v128_v61 = vrot.slane %v127_v60, 1 }
 0x10a   :  { %v129_v62 = vadd.f32 %v128_v61, %v127_v60 }
 0x10c   :  { %131 = vst.msk [vmem:[#allocation2] sm:$0x1] %vm130_vm1, %v129_v62 }
 0x10d   :  { %225 = shalt.err (!%p222_p4)
}
 0x10e   :  { %s226_s4 = scalar_lea.hbm %s379_s3, 16 }
 0x10f   :  { %p227_p5 = scmp.ne.s32.totalorder %s379_s3, %s226_s4  ;;  %p230_p6 = scmp.lt.u32.totalorder %s226_s4, %s379_s3 }
 0x111   :  { %p232_p7 = pnand %p230_p6, %p227_p5 }
 0x113   :  { %235 = shalt.err (!%p232_p7)
}
 0x114   :  { %141 = dma.vmem_to_hbm [thread:$0]  %s139_s28, 16, %s379_s3, [#allocation3]  }
 0x115   :  { %236 = dma.done.wait [#allocation3], 16  }
 0x116   :  { %237 = vsyncadd [#allocation3], 4294967280 }
 0x117   :  { %145 = vsyncpa [#allocation3], 1 }

</bundles_post_ra>
